<compile_context>
chip_gen: v7x
topology: tpu7x:2x2x1
jax: 0.10.0
libtpu: 0.0.40
codegen_flags: <defaults>
</compile_context>

<pallas_src>
import functools
import math

import jax
import jax.numpy as jnp
from jax import lax
from jax.experimental import pallas as pl
from jax.experimental.pallas import tpu as pltpu


# ----------------------------------------------------------------------------
# Small helpers
# ----------------------------------------------------------------------------
def _pick_row_tile(M):
    """Row tile: prefer >=4 grid steps with an even count (pipelining +
    v7x megacore sharding); fall back gracefully for tiny / ragged M."""
    cands = (512, 256, 128, 64, 32, 16, 8)
    for tm in cands:
        if M % tm == 0 and M // tm >= 4 and (M // tm) % 2 == 0:
            return tm
    for tm in cands:
        if M % tm == 0 and M // tm >= 2:
            return tm
    for tm in cands:
        if M % tm == 0:
            return tm
    return M                                    # tiny / ragged: one full block


def _vmem_budget_bytes():
    """~80% of this generation's physical VMEM (v5e/v6e: 128 MiB, v7x: 64 MiB),
    leaving headroom for Mosaic internal scratch and output double buffers."""
    cap = 64 << 20
    try:
        cap = int(getattr(pltpu.get_tpu_info(), "vmem_capacity_bytes", cap))
    except Exception:
        pass
    return int(cap * 0.8)


_VMEM_BUDGET = _vmem_budget_bytes()


def _compiler_params(grid_rank, block_bytes):
    """dimension_semantics=parallel + a VMEM limit sized from the blocks
    (2x for double-buffering + 8 MiB headroom), capped per generation."""
    want = int(2 * block_bytes + (8 << 20))
    limit = min(max(want, 32 << 20), _VMEM_BUDGET)
    return pltpu.CompilerParams(
        dimension_semantics=("parallel",) * grid_rank,
        vmem_limit_bytes=limit,
    )


_INV_SQRT2 = 1.0 / math.sqrt(2.0)


def _gelu_f32(x):
    return 0.5 * x * (1.0 + lax.erf(x * jnp.float32(_INV_SQRT2)))


def _ln_f32(y, g, b, eps):
    mean = jnp.mean(y, axis=-1, keepdims=True)
    var = jnp.mean(jnp.square(y - mean), axis=-1, keepdims=True)
    inv = lax.rsqrt(var + eps)
    return (y - mean) * inv * g + b


# ----------------------------------------------------------------------------
# Pallas kernels
# ----------------------------------------------------------------------------
def _linear_kernel(x_ref, w_ref, b_ref, o_ref, *, activation):
    """o = act(x @ w + b).  x:(tm,K) bf16, w:(K,N) bf16, b:(1,N) f32."""
    y = jnp.dot(x_ref[...], w_ref[...], preferred_element_type=jnp.float32)
    y = y + b_ref[...].astype(jnp.float32)
    if activation == "gelu":                      # exact erf-GELU (HF roberta)
        y = _gelu_f32(y)
    elif activation == "tanh":
        y = jnp.tanh(y)
    o_ref[...] = y.astype(o_ref.dtype)


def _layernorm_kernel(x_ref, g_ref, b_ref, o_ref, *, eps):
    """Row-wise layer norm over the last axis (f32 statistics)."""
    x = x_ref[...].astype(jnp.float32)
    o_ref[...] = _ln_f32(x, g_ref[...], b_ref[...], eps).astype(o_ref.dtype)


def _qkv_kernel(x_ref, w_ref, b_ref, q_ref, k_ref, v_ref, *, hidden):
    """Fused QKV projection; q/k/v emitted as separate lane-dense outputs."""
    y = jnp.dot(x_ref[...], w_ref[...], preferred_element_type=jnp.float32)
    y = (y + b_ref[...].astype(jnp.float32)).astype(q_ref.dtype)
    q_ref[...] = y[:, 0 * hidden:1 * hidden]
    k_ref[...] = y[:, 1 * hidden:2 * hidden]
    v_ref[...] = y[:, 2 * hidden:3 * hidden]


def _linear_add_ln_kernel(x_ref, w_ref, b_ref, r_ref, g_ref, bb_ref, o_ref,
                          *, eps):
    """Fused projection epilogue: o = LN(x @ w + b + residual)."""
    y = jnp.dot(x_ref[...], w_ref[...], preferred_element_type=jnp.float32)
    y = y + b_ref[...].astype(jnp.float32) + r_ref[...].astype(jnp.float32)
    o_ref[...] = _ln_f32(y, g_ref[...], bb_ref[...], eps).astype(o_ref.dtype)


def _ffn_kernel(x_ref, wi_ref, bi_ref, wo_ref, bo_ref, g_ref, bb_ref, o_ref,
                *, eps):
    """Fused FFN block: o = LN(GELU(x @ wi + bi) @ wo + bo + x).

    The (tm, I) intermediate lives only in VMEM; residual is the block input.
    """
    x = x_ref[...]
    inter = jnp.dot(x, wi_ref[...], preferred_element_type=jnp.float32)
    inter = _gelu_f32(inter + bi_ref[...].astype(jnp.float32))
    inter = inter.astype(x.dtype)                 # bf16 back onto the MXU
    y = jnp.dot(inter, wo_ref[...], preferred_element_type=jnp.float32)
    y = y + bo_ref[...].astype(jnp.float32) + x.astype(jnp.float32)
    o_ref[...] = _ln_f32(y, g_ref[...], bb_ref[...], eps).astype(o_ref.dtype)


def _attention_kernel(q_ref, k_ref, v_ref, bias_ref, o_ref,
                      *, num_heads, head_dim, scale):
    """One batch, all heads: softmax(q k^T * scale + bias) v, lane-dense out.

    q/k/v : (1, S, H) bf16   bias : (1, 1, S) f32   o : (1, S, H) bf16
    Heads are split in VMEM; per-head (S,S) f32 temporaries bound VMEM use.
    """
    q = q_ref[0]                                  # (S, H)
    k = k_ref[0]
    v = v_ref[0]
    bias = bias_ref[0].astype(jnp.float32)        # (1, S) -> bcast over queries
    ctx = []
    for h in range(num_heads):                    # small static head loop
        sl = slice(h * head_dim, (h + 1) * head_dim)
        qh, kh, vh = q[:, sl], k[:, sl], v[:, sl]
        # Contract the minor (D) dim directly -- no explicit k.T in HBM.
        s = lax.dot_general(qh, kh, (((1,), (1,)), ((), ())),
                            preferred_element_type=jnp.float32)     # (S, S)
        s = s * jnp.float32(scale) + bias
        m = jnp.max(s, axis=-1, keepdims=True)
        p = jnp.exp(s - m)
        denom = jnp.sum(p, axis=-1, keepdims=True)
        p = p * pl.reciprocal(denom, approx=True)                   # EUP divide
        ctx.append(jnp.dot(p.astype(vh.dtype), vh,
                           preferred_element_type=jnp.float32))      # (S, D)
    # One full-width lane-dense store of the (S, H) context.
    o_ref[0] = jnp.concatenate(ctx, axis=-1).astype(o_ref.dtype)


# ----------------------------------------------------------------------------
# Pallas wrappers
# ----------------------------------------------------------------------------
def pallas_linear(x, w, b, activation="none", out_dtype=jnp.bfloat16):
    M, K = x.shape
    N = w.shape[1]
    tm = _pick_row_tile(M)
    blk = (tm * K * x.dtype.itemsize + K * N * w.dtype.itemsize + N * 4
           + tm * N * (4 + jnp.dtype(out_dtype).itemsize))
    ce = pl.CostEstimate(
        flops=2 * M * K * N,
        transcendentals=M * N if activation in ("gelu", "tanh") else 0,
        bytes_accessed=(M * K * x.dtype.itemsize + K * N * w.dtype.itemsize
                        + N * 4 + M * N * jnp.dtype(out_dtype).itemsize))
    return pl.pallas_call(
        functools.partial(_linear_kernel, activation=activation),
        out_shape=jax.ShapeDtypeStruct((M, N), out_dtype),
        grid=(M // tm,),
        in_specs=[pl.BlockSpec((tm, K), lambda i: (i, 0)),
                  pl.BlockSpec((K, N), lambda i: (0, 0)),   # weight resident
                  pl.BlockSpec((1, N), lambda i: (0, 0))],
        out_specs=pl.BlockSpec((tm, N), lambda i: (i, 0)),
        compiler_params=_compiler_params(1, blk),
        cost_estimate=ce,
    )(x, w, b.reshape(1, N))


def pallas_layernorm(x, g, b, eps=1e-5, out_dtype=jnp.bfloat16):
    M, H = x.shape
    tm = _pick_row_tile(M)
    blk = tm * H * (x.dtype.itemsize + 4 + jnp.dtype(out_dtype).itemsize) + 2 * H * 4
    ce = pl.CostEstimate(
        flops=8 * M * H, transcendentals=M,
        bytes_accessed=M * H * (x.dtype.itemsize
                                + jnp.dtype(out_dtype).itemsize) + 2 * H * 4)
    row = pl.BlockSpec((tm, H), lambda i: (i, 0))
    vec = pl.BlockSpec((1, H), lambda i: (0, 0))
    return pl.pallas_call(
        functools.partial(_layernorm_kernel, eps=eps),
        out_shape=jax.ShapeDtypeStruct((M, H), out_dtype),
        grid=(M // tm,),
        in_specs=[row, vec, vec],
        out_specs=row,
        compiler_params=_compiler_params(1, blk),
        cost_estimate=ce,
    )(x, g.reshape(1, H), b.reshape(1, H))


def pallas_qkv(x, w, b, out_dtype=jnp.bfloat16):
    """Fused QKV projection; returns (q, k, v) each (M, H) lane-dense."""
    M, K = x.shape
    H = w.shape[1] // 3
    tm = _pick_row_tile(M)
    blk = (tm * K * 2 + K * 3 * H * 2 + 3 * H * 4
           + tm * 3 * H * 4 + 3 * tm * H * 2)
    ce = pl.CostEstimate(
        flops=2 * M * K * 3 * H, transcendentals=0,
        bytes_accessed=M * K * 2 + K * 3 * H * 2 + 3 * H * 4 + 3 * M * H * 2)
    row = pl.BlockSpec((tm, H), lambda i: (i, 0))
    return pl.pallas_call(
        functools.partial(_qkv_kernel, hidden=H),
        out_shape=tuple(jax.ShapeDtypeStruct((M, H), out_dtype)
                        for _ in range(3)),
        grid=(M // tm,),
        in_specs=[pl.BlockSpec((tm, K), lambda i: (i, 0)),
                  pl.BlockSpec((K, 3 * H), lambda i: (0, 0)),
                  pl.BlockSpec((1, 3 * H), lambda i: (0, 0))],
        out_specs=(row, row, row),
        compiler_params=_compiler_params(1, blk),
        cost_estimate=ce,
    )(x, w, b.reshape(1, 3 * H))


def pallas_linear_add_ln(x, w, b, residual, g, bb, eps=1e-5,
                         out_dtype=jnp.bfloat16):
    """o = LN(x @ w + b + residual) in one kernel (no HBM round trip)."""
    M, K = x.shape
    N = w.shape[1]
    tm = _pick_row_tile(M)
    blk = (tm * K * 2 + K * N * 2 + N * 4 + tm * N * 2 + 2 * N * 4
           + tm * N * (4 + jnp.dtype(out_dtype).itemsize))
    ce = pl.CostEstimate(
        flops=2 * M * K * N + 10 * M * N, transcendentals=M,
        bytes_accessed=M * K * 2 + K * N * 2 + 2 * M * N * 2 + 3 * N * 4)
    row_n = pl.BlockSpec((tm, N), lambda i: (i, 0))
    vec_n = pl.BlockSpec((1, N), lambda i: (0, 0))
    return pl.pallas_call(
        functools.partial(_linear_add_ln_kernel, eps=eps),
        out_shape=jax.ShapeDtypeStruct((M, N), out_dtype),
        grid=(M // tm,),
        in_specs=[pl.BlockSpec((tm, K), lambda i: (i, 0)),
                  pl.BlockSpec((K, N), lambda i: (0, 0)),
                  vec_n, row_n, vec_n, vec_n],
        out_specs=row_n,
        compiler_params=_compiler_params(1, blk),
        cost_estimate=ce,
    )(x, w, b.reshape(1, N), residual, g.reshape(1, N), bb.reshape(1, N))


def pallas_ffn(x, wi, bi, wo, bo, g, bb, eps=1e-5, out_dtype=jnp.bfloat16):
    """o = LN(GELU(x @ wi + bi) @ wo + bo + x); intermediate stays in VMEM."""
    M, H = x.shape
    I = wi.shape[1]
    tm = _pick_row_tile(M)
    blk = (tm * H * 2 + H * I * 2 + I * 4 + I * H * 2 + H * 4 + 2 * H * 4
           + tm * I * 4 + tm * H * (4 + jnp.dtype(out_dtype).itemsize))
    ce = pl.CostEstimate(
        flops=4 * M * H * I + 10 * M * H, transcendentals=M * I + M,
        bytes_accessed=2 * M * H * 2 + 2 * H * I * 2 + (I + 3 * H) * 4)
    row_h = pl.BlockSpec((tm, H), lambda i: (i, 0))
    vec_h = pl.BlockSpec((1, H), lambda i: (0, 0))
    return pl.pallas_call(
        functools.partial(_ffn_kernel, eps=eps),
        out_shape=jax.ShapeDtypeStruct((M, H), out_dtype),
        grid=(M // tm,),
        in_specs=[row_h,
                  pl.BlockSpec((H, I), lambda i: (0, 0)),
                  pl.BlockSpec((1, I), lambda i: (0, 0)),
                  pl.BlockSpec((I, H), lambda i: (0, 0)),
                  vec_h, vec_h, vec_h],
        out_specs=row_h,
        compiler_params=_compiler_params(1, blk),
        cost_estimate=ce,
    )(x, wi, bi.reshape(1, I), wo, bo.reshape(1, H),
      g.reshape(1, H), bb.reshape(1, H))


def pallas_attention(q, k, v, bias, num_heads, scale):
    """q,k,v: (B, S, H) bf16 lane-dense; bias: (B, 1, S) f32 additive mask."""
    B, S, H = q.shape
    head_dim = H // num_heads
    qkv_spec = pl.BlockSpec((1, S, H), lambda b: (b, 0, 0))
    # Budget includes the per-head (S,S) f32 score/prob/exp temporaries.
    blk = 4 * S * H * q.dtype.itemsize + S * 4 + 3 * S * S * 4
    ce = pl.CostEstimate(
        flops=4 * B * num_heads * S * S * head_dim,
        transcendentals=B * num_heads * S * S,
        bytes_accessed=4 * B * S * H * 2 + B * S * 4)
    # TODO(synk): on v7x with small/odd B, splitting the head loop onto a
    # second grid axis would use both TensorCores; kept per-batch here to
    # preserve the lane-dense (S, H) output block.
    return pl.pallas_call(
        functools.partial(_attention_kernel, num_heads=num_heads,
                          head_dim=head_dim, scale=scale),
        out_shape=jax.ShapeDtypeStruct((B, S, H), q.dtype),
        grid=(B,),
        in_specs=[qkv_spec, qkv_spec, qkv_spec,
                  pl.BlockSpec((1, 1, S), lambda b: (b, 0, 0))],
        out_specs=qkv_spec,
        compiler_params=_compiler_params(1, blk),
        cost_estimate=ce,
    )(q, k, v, bias)


# ----------------------------------------------------------------------------
# Synthetic RoBERTa model (deterministic weights) built on the kernels above
# ----------------------------------------------------------------------------
class RobertaConfig:
    def __init__(self, vocab=100, hidden=64, layers=2, heads=4,
                 intermediate=128, max_pos=32, pad_id=1):
        self.vocab = vocab
        self.hidden = hidden
        self.layers = layers
        self.heads = heads
        self.head_dim = hidden // heads
        self.intermediate = intermediate
        self.max_pos = max_pos
        self.pad_id = pad_id


def init_roberta_params(cfg, key):
    def nrm(k, shape, dtype=jnp.float32):
        return (0.02 * jax.random.normal(k, shape, dtype=jnp.float32)).astype(dtype)

    H, I = cfg.hidden, cfg.intermediate
    keys = iter(jax.random.split(key, 8 + cfg.layers * 8))
    p = {
        "word_emb": nrm(next(keys), (cfg.vocab, H)),
        "pos_emb": nrm(next(keys), (cfg.max_pos, H)),
        "type_emb": nrm(next(keys), (1, H)),
        "emb_ln_g": jnp.ones((H,), jnp.float32),
        "emb_ln_b": jnp.zeros((H,), jnp.float32),
        "pooler_w": nrm(next(keys), (H, H), jnp.bfloat16),
        "pooler_b": jnp.zeros((H,), jnp.float32),
        "layers": [],
    }
    for _ in range(cfg.layers):
        lp = {
            # fused [q|k|v] projection -> one linear kernel call per layer
            "qkv_w": nrm(next(keys), (H, 3 * H), jnp.bfloat16),
            "qkv_b": jnp.zeros((3 * H,), jnp.float32),
            "ao_w": nrm(next(keys), (H, H), jnp.bfloat16),
            "ao_b": jnp.zeros((H,), jnp.float32),
            "aln_g": jnp.ones((H,), jnp.float32),
            "aln_b": jnp.zeros((H,), jnp.float32),
            "i_w": nrm(next(keys), (H, I), jnp.bfloat16),
            "i_b": jnp.zeros((I,), jnp.float32),
            "o_w": nrm(next(keys), (I, H), jnp.bfloat16),
            "o_b": jnp.zeros((H,), jnp.float32),
            "oln_g": jnp.ones((H,), jnp.float32),
            "oln_b": jnp.zeros((H,), jnp.float32),
        }
        p["layers"].append(lp)
    return p


def roberta_forward(cfg, params, word, mask):
    """Returns (sequence_output [B,S,H] bf16, pooled_output [B,H] f32)."""
    B, S = word.shape
    H, NH, D = cfg.hidden, cfg.heads, cfg.head_dim
    M = B * S

    # RoBERTa position ids: cumsum over non-pad tokens offset by pad_id.
    maski = mask.astype(jnp.int32)
    pos_ids = jnp.cumsum(maski, axis=1) * maski + cfg.pad_id

    emb = (jnp.take(params["word_emb"], word, axis=0)
           + jnp.take(params["pos_emb"], pos_ids, axis=0)
           + params["type_emb"][0])                                  # (B,S,H) f32
    h2d = pallas_layernorm(emb.reshape(M, H),
                           params["emb_ln_g"], params["emb_ln_b"])    # bf16

    # HF-style extended additive attention mask, de-duplicated to (B,1,S).
    attn_bias = ((1.0 - mask.astype(jnp.float32)) * -10000.0)[:, None, :]
    scale = 1.0 / math.sqrt(D)

    for lp in params["layers"]:
        # Fused QKV: three lane-dense (M, H) outputs; only free row-major
        # reshapes in the wrapper (no HBM transpose).
        q2d, k2d, v2d = pallas_qkv(h2d, lp["qkv_w"], lp["qkv_b"])
        ctx = pallas_attention(q2d.reshape(B, S, H), k2d.reshape(B, S, H),
                               v2d.reshape(B, S, H), attn_bias, NH, scale)
        # Attention output projection fused with residual-add + LayerNorm.
        h2d = pallas_linear_add_ln(ctx.reshape(M, H), lp["ao_w"], lp["ao_b"],
                                   h2d, lp["aln_g"], lp["aln_b"])
        # FFN (GELU matmul + output matmul) fused with residual + LayerNorm;
        # the (M, I) intermediate never leaves VMEM.
        h2d = pallas_ffn(h2d, lp["i_w"], lp["i_b"], lp["o_w"], lp["o_b"],
                         lp["oln_g"], lp["oln_b"])

    h = h2d.reshape(B, S, H)
    # Pooler: tanh(W * hidden[:, 0] + b)
    pooled = pallas_linear(h[:, 0, :], params["pooler_w"], params["pooler_b"],
                           activation="tanh", out_dtype=jnp.float32)
    return h, pooled


class RobertaSentenceEncoder:
    """JAX/Pallas re-implementation of the PyTorch module's forward()."""

    def __init__(self, cfg, params, max_length, cat_entity_rep=False):
        self.cfg = cfg
        self.params = params
        self.max_length = max_length
        self.cat_entity_rep = cat_entity_rep
        # TODO(synk): tokenize() is pure host-side string processing
        # (RobertaTokenizer); it has no Pallas equivalent and is out of scope.

    def forward(self, inputs):
        seq_out, pooled = roberta_forward(self.cfg, self.params,
                                          inputs["word"], inputs["mask"])
        if not self.cat_entity_rep:
            return pooled
        B = inputs["word"].shape[0]
        rng = jnp.arange(B)
        seq_f32 = seq_out.astype(jnp.float32)
        h_state = seq_f32[rng, inputs["pos1"]]
        t_state = seq_f32[rng, inputs["pos2"]]
        return jnp.concatenate((h_state, t_state), axis=-1)

    __call__ = forward


# ----------------------------------------------------------------------------
# Demo
# ----------------------------------------------------------------------------
if __name__ == "__main__":
    key = jax.random.PRNGKey(0)
    k_param, k_word = jax.random.split(key)

    B, S = 2, 16
    cfg = RobertaConfig(vocab=100, hidden=64, layers=2, heads=4,
                        intermediate=128, max_pos=32, pad_id=1)
    params = init_roberta_params(cfg, k_param)

    word = jax.random.randint(k_word, (B, S), 2, cfg.vocab, dtype=jnp.int32)
    mask = jnp.ones((B, S), dtype=jnp.int32)
    mask = mask.at[1, -4:].set(0)                      # second sentence padded
    pos1 = jnp.array([1, 2], dtype=jnp.int32)
    pos2 = jnp.array([5, 7], dtype=jnp.int32)
    inputs = {"word": word, "mask": mask, "pos1": pos1, "pos2": pos2}

    # Default path: pooled output  (B, H)
    enc = RobertaSentenceEncoder(cfg, params, max_length=S, cat_entity_rep=False)
    pooled = jax.block_until_ready(enc(inputs))
    assert pooled.shape == (B, cfg.hidden)
    assert bool(jnp.all(jnp.isfinite(pooled)))

    # cat_entity_rep path: concat of entity hidden states  (B, 2H)
    enc_cat = RobertaSentenceEncoder(cfg, params, max_length=S, cat_entity_rep=True)
    state = jax.block_until_ready(enc_cat(inputs))
    assert state.shape == (B, 2 * cfg.hidden)
    assert bool(jnp.all(jnp.isfinite(state)))

    print("KERNEL_OK")
</pallas_src>

<mosaic_0001>
module attributes {stable_mosaic.version = 11 : i64} {
  func.func @_layernorm_kernel(%arg0: i32, %arg1: memref<8x64xf32, #tpu.memory_space<vmem>>, %arg2: memref<1x64xf32, #tpu.memory_space<vmem>>, %arg3: memref<1x64xf32, #tpu.memory_space<vmem>>, %arg4: memref<8x64xbf16, #tpu.memory_space<vmem>>) attributes {dimension_semantics = [#tpu.dimension_semantics<parallel>], iteration_bounds = array<i64: 4>, scalar_prefetch = 0 : i64, scratch_operands = 0 : i64, tpu.core_type = #tpu.core_type<tc>, window_params = [{transform_indices = @transform_0, window_bounds = array<i64: 8, 64>}, {pipeline_mode = #tpu.pipeline_mode<synchronous>, transform_indices = @transform_1, window_bounds = array<i64: 1, 64>}, {pipeline_mode = #tpu.pipeline_mode<synchronous>, transform_indices = @transform_2, window_bounds = array<i64: 1, 64>}, {transform_indices = @transform_3, window_bounds = array<i64: 8, 64>}]} {
    %c0 = arith.constant 0 : index
    %c0_0 = arith.constant 0 : index
    %0 = vector.load %arg1[%c0, %c0_0] : memref<8x64xf32, #tpu.memory_space<vmem>>, vector<8x64xf32>
    %c0_1 = arith.constant 0 : index
    %c0_2 = arith.constant 0 : index
    %1 = vector.load %arg2[%c0_1, %c0_2] : memref<1x64xf32, #tpu.memory_space<vmem>>, vector<1x64xf32>
    %c0_3 = arith.constant 0 : index
    %c0_4 = arith.constant 0 : index
    %2 = vector.load %arg3[%c0_3, %c0_4] : memref<1x64xf32, #tpu.memory_space<vmem>>, vector<1x64xf32>
    %cst = arith.constant dense<0.000000e+00> : vector<8xf32>
    %3 = vector.multi_reduction <add>, %0, %cst [1] : vector<8x64xf32> to vector<8xf32>
    %4 = vector.shape_cast %3 : vector<8xf32> to vector<8x1xf32>
    %cst_5 = arith.constant 6.400000e+01 : f32
    %5 = vector.broadcast %cst_5 : f32 to vector<8x1xf32>
    %6 = arith.divf %4, %5 : vector<8x1xf32>
    %7 = vector.broadcast %6 : vector<8x1xf32> to vector<8x64xf32>
    %8 = arith.subf %0, %7 : vector<8x64xf32>
    %9 = arith.mulf %8, %8 : vector<8x64xf32>
    %cst_6 = arith.constant dense<0.000000e+00> : vector<8xf32>
    %10 = vector.multi_reduction <add>, %9, %cst_6 [1] : vector<8x64xf32> to vector<8xf32>
    %11 = vector.shape_cast %10 : vector<8xf32> to vector<8x1xf32>
    %cst_7 = arith.constant 6.400000e+01 : f32
    %12 = vector.broadcast %cst_7 : f32 to vector<8x1xf32>
    %13 = arith.divf %11, %12 : vector<8x1xf32>
    %cst_8 = arith.constant 9.99999974E-6 : f32
    %14 = vector.broadcast %cst_8 : f32 to vector<8x1xf32>
    %15 = arith.addf %13, %14 : vector<8x1xf32>
    %16 = math.rsqrt %15 : vector<8x1xf32>
    %17 = vector.broadcast %6 : vector<8x1xf32> to vector<8x64xf32>
    %18 = arith.subf %0, %17 : vector<8x64xf32>
    %19 = vector.broadcast %16 : vector<8x1xf32> to vector<8x64xf32>
    %20 = arith.mulf %18, %19 : vector<8x64xf32>
    %21 = vector.broadcast %1 : vector<1x64xf32> to vector<8x64xf32>
    %22 = arith.mulf %20, %21 : vector<8x64xf32>
    %23 = vector.broadcast %2 : vector<1x64xf32> to vector<8x64xf32>
    %24 = arith.addf %22, %23 : vector<8x64xf32>
    %25 = arith.truncf %24 : vector<8x64xf32> to vector<8x64xbf16>
    %c0_9 = arith.constant 0 : index
    %c0_10 = arith.constant 0 : index
    %26 = vector.load %arg4[%c0_9, %c0_10] : memref<8x64xbf16, #tpu.memory_space<vmem>>, vector<8x64xbf16>
    tpu.vector_store %arg4[%c0_9, %c0_10], %25 {strides = array<i32>} : memref<8x64xbf16, #tpu.memory_space<vmem>>, vector<8x64xbf16>,
    return
  }
  func.func @transform_0(%arg0: i32) -> (i32, i32) {
    %c0_i32 = arith.constant 0 : i32
    %c0_i32_0 = arith.constant 0 : i32
    return %arg0, %c0_i32 : i32, i32
  }
  func.func @transform_1(%arg0: i32) -> (i32, i32) {
    %c0_i32 = arith.constant 0 : i32
    %c0_i32_0 = arith.constant 0 : i32
    %c0_i32_1 = arith.constant 0 : i32
    return %c0_i32, %c0_i32_0 : i32, i32
  }
  func.func @transform_2(%arg0: i32) -> (i32, i32) {
    %c0_i32 = arith.constant 0 : i32
    %c0_i32_0 = arith.constant 0 : i32
    %c0_i32_1 = arith.constant 0 : i32
    return %c0_i32, %c0_i32_0 : i32, i32
  }
  func.func @transform_3(%arg0: i32) -> (i32, i32) {
    %c0_i32 = arith.constant 0 : i32
    %c0_i32_0 = arith.constant 0 : i32
    return %arg0, %c0_i32 : i32, i32
  }
}

</mosaic_0001>

<bundles_post_ra>
// kernel: tpu_custom_call.1
= control target key start
LH: loop header
LB: loop body
LE: loop exit
PB: predicated region body
PF: predicated region fallthrough
CT: control target
= control target key end

     0   :  { %8 = vsyncpa [#allocation3], 0  ;;  %s653_s0 = inlined_call_operand.hbm [shape: f32[32,64], index: 0, kind: input, shape index: {}]   ;;  %s654_s1 = inlined_call_operand.vmem [shape: f32[1,64], index: 1, kind: input, shape index: {}]   ;;  %s655_s2 = inlined_call_operand.vmem [shape: f32[1,64], index: 2, kind: input, shape index: {}]   ;;  %s656_s3 = inlined_call_operand.hbm [shape: bf16[32,64], index: 3, kind: output, shape index: {}]  }
   0x1   :  { %10 = vsyncpa [#allocation3 + $0x1], 0 }
   0x2   :  { %11 = vsyncpa [#allocation4], 0 }
   0x3   :  { %13 = vsyncpa [#allocation4 + $0x1], 0  ;;  %s487_s12 = smov 0   ;;  %s489_s13 = smov 0  }
   0x4   :  { %s491_s14 = smov 0   ;;  %s493_s15 = smov 0  }
   0x5 LB: > { %s508_s16 = sadd.s32 4294967295, %s463_s15   ;;  %s305_s17 = sadd.s32 4294967294, %s463_s15   ;;  %s463_s15 = sphi %s493_s15, %s670_s15   ;;  %s459_s14 = sphi %s491_s14, %s669_s14   ;;  %s455_s13 = sphi %s489_s13, %s668_s13   ;;  %s451_s12 = sphi %s487_s12, %s667_s12  }
   0x6   : > { %s512_s18 = sadd.s32 1, %s463_s15   ;;  %s26_s19 = sadd.s32 1, %s459_s14 }
   0x7   : > { %s23_s20 = ssub.s32 %s463_s15, %s512_s18  ;;  %p33_p0 = scmp.ne.s32.totalorder %s459_s14, %s455_s13 }
   0x8   : > { %p24_p1 = scmp.eq.s32.totalorder %s23_s20, 0  ;;  %p34_p2 = scmp.eq.s32.totalorder %s463_s15, 0 }
   0x9   : > { %p39_p3 = scmp.ne.s32.totalorder %s455_s13, %s451_s12  ;;  %p40_p4 = scmp.eq.s32.totalorder %s508_s16, 0 }
   0xa   : > { %s524_s21 = scalar_select %p24_p1, %s459_s14, %s26_s19  }
   0xb   : > { %p526_p5 = por %p34_p2, %p33_p0  ;;  %p530_p6 = por %p40_p4, %p39_p3 }
   0xc   : > { %p105_p7 = scmp.eq.s32.totalorder %s508_s16, 3  ;;  %p111_p8 = scmp.eq.s32.totalorder %s305_s17, 3 }
   0xd   : > { %p331_p9 = scmp.lt.s32.totalorder %s463_s15, 4  ;;  %s137_s26 = sand.u32 1, %s459_s14  }
   0xe   : > { %p536_p10 = por %p105_p7, %p33_p0  ;;  %p540_p11 = por %p111_p8, %p39_p3 }
   0xf   : > { %s309_s27 = sshll.u32 %s463_s15, 7  ;;  %s308_s28 = sshll.u32 %s137_s26, 3 }
  0x10   : > { %s660_s24 = scalar_select %p536_p10, 1, 0 }
  0x11   : > { %s661_s25 = scalar_select %p540_p11, 1, 0 }
  0x12   : > { %s549_s4 = scalar_lea.hbm %s653_s0, %s309_s27  ;;  %s141_s5 = scalar_lea.vmem [#allocation2], %s308_s28 }
  0x13   : > { %s148_s6 = sshll.u32 %s141_s5, 4  ;;  %p553_p12 = pnand %p331_p9, %p526_p5  ;;  %s557_s6 = int_to_ptr.vmem [resolvable:$true] %s148_s6 }
  0x14   : > { %s138_s8 = scalar_lea.sflag [#allocation3], %s137_s26  ;;  %s367_s9 = scalar_lea.hbm %s549_s4, 128 }
  0x15   : > { %p368_p1 = scmp.ne.s32.totalorder %s549_s4, %s367_s9  ;;  %p369_p2 = pneg %p553_p12 }
  0x16   : > { %s372_s17 = scalar_lea.hbm %s653_s0, 512  ;;  %p373_p5 = scmp.lt.u32.totalorder %s549_s4, %s653_s0 }
  0x17   : > { %p370_p3 = pnand %p369_p2, %p368_p1  ;;  %p374_p7 = scmp.lt.u32.totalorder %s372_s17, %s367_s9 }
  0x18   : > { %p376_p9 = scmp.lt.u32.totalorder %s367_s9, %s549_s4 }
  0x19   : > { %p371_p4 = pneg %p370_p3  ;;  %p375_p8 = por %p374_p7, %p373_p5 }
  0x1b   : > { %p377_p13 = por %p376_p9, %p375_p8 }
  0x1d   : > { %p378_p0 = pnand %p377_p13, %p371_p4 }
  0x1f   : > { %381 = shalt.err (!%p378_p0)
}
  0x20   : > { %s382_s22 = scalar_lea.vmem %s557_s6, 128  ;;  %s465_s26 = smov [#allocation2]  }
  0x21   : > { %p383_p1 = scmp.ne.s32.totalorder %s557_s6, %s382_s22  ;;  %s387_s27 = sshll.u32 %s465_s26, 4  ;;  %s388_s27 = int_to_ptr.vmem [resolvable:$false] %s387_s27 }
  0x22   : > { %s389_s28 = scalar_lea.vmem %s388_s27, 256  ;;  %p390_p10 = scmp.lt.s32.totalorder %s557_s6, %s388_s27 }
  0x23   : > { %p385_p3 = pnand %p383_p1, %p369_p2  ;;  %p391_p5 = scmp.lt.s32.totalorder %s389_s28, %s382_s22 }
  0x25   : > { %p386_p11 = pneg %p385_p3  ;;  %p392_p7 = por %p391_p5, %p390_p10 }
  0x27   : > { %p393_p8 = pnand %p392_p7, %p386_p11 }
  0x29   : > { %396 = shalt.err (!%p393_p8)
}
  0x2a   : > { %326 = dma.hbm_to_vmem [thread:$0]  (!%p553_p12), %s549_s4, 128, %s557_s6, %s138_s8  }
  0x2b   : > { %p663_p13 = scmp.lt.s32.totalorder %s463_s15, 5  ;;  %p664_p0 = scmp.ge.s32.totalorder %s463_s15, 1 }
  0x2d   : > { %p154_p2 = pnand %p664_p0, %p663_p13 }
  0x2e   : > { %s591_s29 = sand.u32 (!%p154_p2), 1, %s455_s13  }
  0x2f   : > { %157 = sbr.rel (%p154_p2) target bundleno = 385 (0x181), region = 32  ;;  %s311_s30 = sshll.u32 (!%p154_p2), %s591_s29, 3 }
  0x30   : > { %s160_s5 = scalar_lea.sflag (!%p154_p2), [#allocation3], %s591_s29  ;;  %s163_s9 = scalar_lea.vmem (!%p154_p2), [#allocation2], %s311_s30 }
  0x36   : > { %442 = dma.done.wait (%p530_p6), %s160_s5, 128  }
  0x37   : > { %444 = vsyncadd (%p530_p6), %s160_s5, 4294967168  ;;  %vm189_vm0 = vcmask 523264   ;;  %v186_v0 = vld [vmem:[%s163_s9] sm:$0xff]  ;;  %s312_s4 = sshll.u32 %s591_s29, 2  ;;  %s316_s10 = sshll.u32 %s508_s16, 6  ;;  %vm219_vm1 = vcmask 519168  }
  0x38   : > { %v190_v1 = vsel %vm189_vm0, %v186_v0, 0.0  ;;  %v313_v11 = vld [vmem:[%s654_s1] ss:$0 sm:$0xff]  ;;  %s185_s11 = scalar_lea.vmem [#allocation5], %s312_s4  ;;  %s610_s22 = scalar_lea.hbm %s656_s3, %s316_s10 }
  0x39   : > { %191 = vadd.xlane.f32.xlu0 %v190_v1  ;;  %v314_v13 = vld [vmem:[%s655_s2] ss:$0 sm:$0xff]  ;;  %s235_s17 = sshll.u32 %s185_s11, 4  ;;  %s222_s26 = scalar_lea.sflag [#allocation4], %s591_s29  ;;  %s612_s17 = int_to_ptr.vmem [resolvable:$true] %s235_s17 }
  0x3a   : > { %s397_s27 = scalar_lea.vmem %s612_s17, 64  ;;  %p665_p10 = scmp.ne.s32.totalorder %s660_s24, 0 }
  0x3b   : > { %p398_p6 = scmp.ne.s32.totalorder %s612_s17, %s397_s27  ;;  %s466_s16 = smov [#allocation5]  }
  0x3c   : > { %s401_s28 = sshll.u32 %s466_s16, 4  ;;  %s402_s28 = int_to_ptr.vmem [resolvable:$false] %s401_s28 }
  0x3d   : > { %p399_p11 = pnand %p398_p6, %p665_p10  ;;  %s403_s30 = scalar_lea.vmem %s402_s28, 128 }
  0x3e   : > { %p404_p4 = scmp.lt.s32.totalorder %s612_s17, %s402_s28  ;;  %p405_p9 = scmp.lt.s32.totalorder %s403_s30, %s397_s27 }
  0x3f   : > { %p400_p12 = pneg %p399_p11 }
  0x40   : > { %p406_p1 = por %p405_p9, %p404_p4 }
  0x42   : > { %p407_p3 = pnand %p406_p1, %p400_p12 }
  0xc6   : > { %v192_v2 = vpop.xlane.xlu0 %191 }
  0xc7   : > { %v194_v3 = vmul.f32 0.015625, %v192_v2 }
  0xc9   : > { %v195_v4 = vsub.f32 %v186_v0, %v194_v3 }
  0xcb   : > { %v196_v5 = vmul.f32 %v195_v4, %v195_v4 }
  0xcd   : > { %v197_v6 = vsel %vm189_vm0, %v196_v5, 0.0 }
  0xce   : > { %198 = vadd.xlane.f32.xlu0 %v197_v6 }
 0x15b   : > { %v199_v7 = vpop.xlane.xlu0 %198 }
 0x15c   : > { %v200_v8 = vmul.f32 0.015625, %v199_v7 }
 0x15e   : > { %v201_v9 = vadd.f32 1e-05, %v200_v8 }
 0x160   : > { %365 = vrsqrt.f32 %v201_v9 }
 0x16a   : > { %v366_v10 = vpop.eup %365 }
 0x16b   : > { %v203_v12 = vmul.f32 %v366_v10, %v195_v4 }
 0x16d   : > { %v210_v14 = vmul.f32 %v313_v11, %v203_v12 }
 0x16f   : > { %v217_v15 = vadd.f32 %v314_v13, %v210_v14 }
 0x171   : > { %v218_v16 = vpack.c.bf16 %v217_v15, %v217_v15 }
 0x173   : > { %220 = vst.msk [vmem:[%s185_s11] sm:$0xf] %vm219_vm1, %v218_v16 }
 0x174   : > { %410 = shalt.err (!%p407_p3)
}
 0x175   : > { %s411_s29 = scalar_lea.hbm %s610_s22, 64  ;;  %s415_s4 = scalar_lea.hbm %s656_s3, 256 }
 0x176   : > { %p412_p5 = scmp.ne.s32.totalorder %s610_s22, %s411_s29  ;;  %p416_p13 = scmp.lt.u32.totalorder %s610_s22, %s656_s3 }
 0x177   : > { %p417_p0 = scmp.lt.u32.totalorder %s415_s4, %s411_s29  ;;  %p419_p6 = scmp.lt.u32.totalorder %s411_s29, %s610_s22 }
 0x178   : > { %p413_p7 = pnand %p412_p5, %p665_p10 }
 0x179   : > { %p418_p2 = por %p417_p0, %p416_p13 }
 0x17a   : > { %p414_p8 = pneg %p413_p7 }
 0x17b   : > { %p420_p11 = por %p419_p6, %p418_p2 }
 0x17d   : > { %p421_p12 = pnand %p420_p11, %p414_p8 }
 0x17f   : > { %424 = shalt.err (!%p421_p12)
}
 0x180   : > { %321 = dma.vmem_to_hbm [thread:$0]  (%p665_p10), %s612_s17, 64, %s610_s22, %s222_s26  }
 0x181 PF: > { %p332_p4 = scmp.ge.s32.totalorder %s463_s15, 2  ;;  %s247_s7 = sand.u32 1, %s451_s12  }
 0x182   : > { %p666_p9 = scmp.ne.s32.totalorder %s661_s25, 0  ;;  %s248_s8 = scalar_lea.sflag [#allocation4], %s247_s7 }
 0x184   : > { %p328_p1 = pnand %p332_p4, %p666_p9 }
 0x186   : > { %446 = dma.done.wait (!%p328_p1), %s248_s8, 64  }
 0x187   : > { %448 = vsyncadd (!%p328_p1), %s248_s8, 4294967232  ;;  %p16_p3 = scmp.ge.s32.totalorder %s512_s18, 6   ;;  %s667_s12 = smov %s455_s13 }
 0x188   : > { %s668_s13 = smov %s459_s14  ;;  %s669_s14 = smov %s524_s21 }
 0x189   : > { %s670_s15 = smov %s512_s18  ;;  %18 = sbr.rel (!%p16_p3) target bundleno = 5 (0x5), region = 77 }
 0x190   :  { %253 = vsyncpa [#allocation3], 1 }
 0x191   :  { %255 = vsyncpa [#allocation3 + $0x1], 1 }
 0x192   :  { %256 = vsyncpa [#allocation4], 1 }
 0x193   :  { %258 = vsyncpa [#allocation4 + $0x1], 1 }

</bundles_post_ra>
